<compile_context>
chip_gen: v7x
topology: tpu7x:2x2x1
jax: 0.10.0
libtpu: 0.0.40
codegen_flags: <defaults>
</compile_context>

<pallas_src>
import jax
import jax.numpy as jnp
from jax.experimental import pallas as pl
from jax.experimental.pallas import tpu as pltpu


# ----------------------------- Pallas kernel ------------------------------ #
def _lstm_chunk_kernel(x_ref, wih_ref, whh_ref, b_ref, out_ref, h_sc, c_sc):
    """One LSTM layer, one time-chunk per grid step (grid axis 0 = chunk, sequential).

    x_ref   : (T_CHUNK*B, D_in)  time-major, flattened chunk of inputs
    wih_ref : (D_in, 4H)         transposed weight_ih
    whh_ref : (H, 4H)            transposed weight_hh
    b_ref   : (1, 4H)            b_ih + b_hh
    out_ref : (T_CHUNK*B, H)     hidden states for the chunk
    h_sc/c_sc : (B, H)           recurrent carry, persists across grid steps
    """
    ci = pl.program_id(0)

    @pl.when(ci == 0)
    def _():
        h_sc[...] = jnp.zeros_like(h_sc)
        c_sc[...] = jnp.zeros_like(c_sc)

    B, H = h_sc.shape
    t_chunk = x_ref.shape[0] // B

    # Hoisted, batched input projection + bias for the whole chunk (no time dependency):
    # one MXU-shaped matmul instead of a tiny (B, D) matmul on every serial timestep.
    gx = (jnp.dot(x_ref[...], wih_ref[...], preferred_element_type=jnp.float32)
          + b_ref[...])                                   # (T_CHUNK*B, 4H)

    whh = whh_ref[...]                                    # (H, 4H), loaded once per chunk
    h = h_sc[...]
    c = c_sc[...]

    # Serial recurrence over the chunk; statically unrolled (t_chunk is a small Python int).
    for s in range(t_chunk):
        gates = gx[s * B:(s + 1) * B, :] + jnp.dot(
            h, whh, preferred_element_type=jnp.float32)   # (B, 4H)
        i_g = jax.nn.sigmoid(gates[:, 0 * H:1 * H])
        f_g = jax.nn.sigmoid(gates[:, 1 * H:2 * H])
        g_g = jnp.tanh(gates[:, 2 * H:3 * H])
        o_g = jax.nn.sigmoid(gates[:, 3 * H:4 * H])
        c = f_g * c + i_g * g_g
        h = o_g * jnp.tanh(c)
        out_ref[s * B:(s + 1) * B, :] = h.astype(out_ref.dtype)

    h_sc[...] = h
    c_sc[...] = c


def lstm_layer_pallas(x_flat, w_ih_t, w_hh_t, b, *, batch, t_chunk):
    """Run one unidirectional LSTM layer over a time-major flattened sequence.

    x_flat : (T_pad*B, D_in) float32, time-major flattened ((t, b) -> row t*B + b)
    w_ih_t : (D_in, 4H)      transposed PyTorch weight_ih
    w_hh_t : (H, 4H)         transposed PyTorch weight_hh
    b      : (1, 4H)         b_ih + b_hh
    returns (T_pad*B, H) hidden states (same flattened layout).
    """
    TB, D = x_flat.shape
    H = w_hh_t.shape[0]
    rows_per_chunk = t_chunk * batch
    n_chunks = TB // rows_per_chunk

    return pl.pallas_call(
        _lstm_chunk_kernel,
        out_shape=jax.ShapeDtypeStruct((TB, H), jnp.float32),
        grid_spec=pltpu.PrefetchScalarGridSpec(
            num_scalar_prefetch=0,
            grid=(n_chunks,),
            in_specs=[
                pl.BlockSpec((rows_per_chunk, D), lambda c: (c, 0)),
                pl.BlockSpec((D, 4 * H), lambda c: (0, 0)),
                pl.BlockSpec((H, 4 * H), lambda c: (0, 0)),
                pl.BlockSpec((1, 4 * H), lambda c: (0, 0)),
            ],
            out_specs=pl.BlockSpec((rows_per_chunk, H), lambda c: (c, 0)),
            scratch_shapes=[
                pltpu.VMEM((batch, H), jnp.float32),   # h carry
                pltpu.VMEM((batch, H), jnp.float32),   # c carry
            ],
        ),
        compiler_params=pltpu.CompilerParams(
            dimension_semantics=("arbitrary",)),       # sequential recurrence over chunks
    )(x_flat, w_ih_t, w_hh_t, b)


# ------------------------------ Model glue -------------------------------- #
def init_lstm_uni_params(key, input_size, hidden_size, num_layers):
    """Deterministic init matching nn.LSTM parameter shapes (unidirectional)."""
    H = hidden_size
    bound = 1.0 / float(H) ** 0.5
    params = []
    for layer in range(num_layers):
        d_in = input_size if layer == 0 else H
        key, k1, k2, k3, k4 = jax.random.split(key, 5)
        w_ih = jax.random.uniform(k1, (4 * H, d_in), jnp.float32, -bound, bound)
        w_hh = jax.random.uniform(k2, (4 * H, H), jnp.float32, -bound, bound)
        b_ih = jax.random.uniform(k3, (4 * H,), jnp.float32, -bound, bound)
        b_hh = jax.random.uniform(k4, (4 * H,), jnp.float32, -bound, bound)
        params.append((w_ih, w_hh, b_ih, b_hh))
    return params


def lstm_uni_forward(params, x, *, t_chunk=8):
    """Equivalent of LSTM_uni_toLinear.forward: returns (B, hidden_size)."""
    B, T, D = x.shape

    # Keep the flattened chunk row-count sublane-aligned (multiple of 8).
    while (t_chunk * B) % 8 != 0:
        t_chunk += 1
    n_chunks = -(-T // t_chunk)
    T_pad = n_chunks * t_chunk

    h = jnp.transpose(x, (1, 0, 2)).astype(jnp.float32)   # (T, B, D) time-major
    if T_pad != T:
        # Zero-pad trailing timesteps; they are processed after all real ones so they
        # never affect outputs at time indices < T (we only read index T-1 at the end).
        h = jnp.pad(h, ((0, T_pad - T), (0, 0), (0, 0)))
    h = h.reshape(T_pad * B, D)                            # (T_pad*B, D)

    for (w_ih, w_hh, b_ih, b_hh) in params:
        h = lstm_layer_pallas(
            h,
            jnp.transpose(w_ih),               # (D_in, 4H)
            jnp.transpose(w_hh),               # (H, 4H)
            (b_ih + b_hh)[None, :],            # (1, 4H)
            batch=B, t_chunk=t_chunk,
        )                                      # (T_pad*B, H)

    H = h.shape[-1]
    # Last layer, last *real* timestep  ==  r_out[:, -1, :]
    return h.reshape(T_pad, B, H)[T - 1]       # (B, hidden_size)


# --------------------------- pure-JAX reference ---------------------------- #
def lstm_uni_ref(params, x):
    h = jnp.transpose(x, (1, 0, 2)).astype(jnp.float32)    # (T, B, D)
    for (w_ih, w_hh, b_ih, b_hh) in params:
        T, B, _ = h.shape
        H = w_hh.shape[1]

        def step(carry, x_t, w_ih=w_ih, w_hh=w_hh, b_ih=b_ih, b_hh=b_hh, H=H):
            hh, cc = carry
            gates = x_t @ w_ih.T + hh @ w_hh.T + b_ih + b_hh
            i = jax.nn.sigmoid(gates[:, :H])
            f = jax.nn.sigmoid(gates[:, H:2 * H])
            g = jnp.tanh(gates[:, 2 * H:3 * H])
            o = jax.nn.sigmoid(gates[:, 3 * H:])
            cc = f * cc + i * g
            hh = o * jnp.tanh(cc)
            return (hh, cc), hh

        init = (jnp.zeros((B, H), jnp.float32), jnp.zeros((B, H), jnp.float32))
        _, ys = jax.lax.scan(step, init, h)
        h = ys
    return h[-1]                                            # (B, hidden_size)


# --------------------------------- main ------------------------------------ #
if __name__ == "__main__":
    B, T, INPUT_SIZE = 2, 10, 16
    HIDDEN_SIZE, NUM_LAYERS = 32, 2

    key = jax.random.PRNGKey(0)
    key, kx, kp = jax.random.split(key, 3)
    x = jax.random.normal(kx, (B, T, INPUT_SIZE), jnp.float32)

    params = init_lstm_uni_params(kp, INPUT_SIZE, HIDDEN_SIZE, NUM_LAYERS)

    out = jax.block_until_ready(lstm_uni_forward(params, x, t_chunk=8))
    assert out.shape == (B, HIDDEN_SIZE), out.shape

    ref = jax.block_until_ready(lstm_uni_ref(params, x))
    assert jnp.allclose(out, ref, atol=1e-5, rtol=1e-5), float(jnp.max(jnp.abs(out - ref)))

    print("KERNEL_OK")
</pallas_src>

<mosaic_0001>
module attributes {stable_mosaic.version = 11 : i64} {
  func.func @_lstm_chunk_kernel(%arg0: i32, %arg1: memref<16x16xf32, #tpu.memory_space<vmem>>, %arg2: memref<16x128xf32, #tpu.memory_space<vmem>>, %arg3: memref<32x128xf32, #tpu.memory_space<vmem>>, %arg4: memref<1x128xf32, #tpu.memory_space<vmem>>, %arg5: memref<16x32xf32, #tpu.memory_space<vmem>>, %arg6: memref<2x32xf32, #tpu.memory_space<vmem>>, %arg7: memref<2x32xf32, #tpu.memory_space<vmem>>) attributes {dimension_semantics = [#tpu.dimension_semantics<arbitrary>], iteration_bounds = array<i64: 2>, scalar_prefetch = 0 : i64, scratch_operands = 2 : i64, tpu.core_type = #tpu.core_type<tc>, window_params = [{transform_indices = @transform_0, window_bounds = array<i64: 16, 16>}, {pipeline_mode = #tpu.pipeline_mode<synchronous>, transform_indices = @transform_1, window_bounds = array<i64: 16, 128>}, {pipeline_mode = #tpu.pipeline_mode<synchronous>, transform_indices = @transform_2, window_bounds = array<i64: 32, 128>}, {pipeline_mode = #tpu.pipeline_mode<synchronous>, transform_indices = @transform_3, window_bounds = array<i64: 1, 128>}, {transform_indices = @transform_4, window_bounds = array<i64: 16, 32>}]} {
    %c0_i32 = arith.constant 0 : i32
    %0 = arith.cmpi eq, %arg0, %c0_i32 : i32
    %1 = arith.extui %0 : i1 to i32
    %c0_i32_0 = arith.constant 0 : i32
    %2 = arith.cmpi ne, %1, %c0_i32_0 : i32
    scf.if %2 {
      %cst_57 = arith.constant 0.000000e+00 : f32
      %246 = vector.broadcast %cst_57 : f32 to vector<2x32xf32>
      %c0_58 = arith.constant 0 : index
      %c0_59 = arith.constant 0 : index
      %247 = vector.load %arg6[%c0_58, %c0_59] : memref<2x32xf32, #tpu.memory_space<vmem>>, vector<2x32xf32>
      tpu.vector_store %arg6[%c0_58, %c0_59], %246 {strides = array<i32>} : memref<2x32xf32, #tpu.memory_space<vmem>>, vector<2x32xf32>,
      %cst_60 = arith.constant 0.000000e+00 : f32
      %248 = vector.broadcast %cst_60 : f32 to vector<2x32xf32>
      %c0_61 = arith.constant 0 : index
      %c0_62 = arith.constant 0 : index
      %249 = vector.load %arg7[%c0_61, %c0_62] : memref<2x32xf32, #tpu.memory_space<vmem>>, vector<2x32xf32>
      tpu.vector_store %arg7[%c0_61, %c0_62], %248 {strides = array<i32>} : memref<2x32xf32, #tpu.memory_space<vmem>>, vector<2x32xf32>,
    } else {
    }
    %c0 = arith.constant 0 : index
    %c0_1 = arith.constant 0 : index
    %3 = vector.load %arg1[%c0, %c0_1] : memref<16x16xf32, #tpu.memory_space<vmem>>, vector<16x16xf32>
    %c0_2 = arith.constant 0 : index
    %c0_3 = arith.constant 0 : index
    %4 = vector.load %arg2[%c0_2, %c0_3] : memref<16x128xf32, #tpu.memory_space<vmem>>, vector<16x128xf32>
    %cst = arith.constant dense<0.000000e+00> : vector<16x128xf32>
    %5 = tpu.matmul %3, %4, %cst {dimension_numbers = #tpu.dot_dimension_numbers<[1], [0], [0], [1], [0, 0, 1, 1], [], []>} : vector<16x16xf32>, vector<16x128xf32>, vector<16x128xf32> -> vector<16x128xf32>
    %c0_4 = arith.constant 0 : index
    %c0_5 = arith.constant 0 : index
    %6 = vector.load %arg4[%c0_4, %c0_5] : memref<1x128xf32, #tpu.memory_space<vmem>>, vector<1x128xf32>
    %7 = vector.broadcast %6 : vector<1x128xf32> to vector<16x128xf32>
    %8 = arith.addf %5, %7 : vector<16x128xf32>
    %c0_6 = arith.constant 0 : index
    %c0_7 = arith.constant 0 : index
    %9 = vector.load %arg3[%c0_6, %c0_7] : memref<32x128xf32, #tpu.memory_space<vmem>>, vector<32x128xf32>
    %c0_8 = arith.constant 0 : index
    %c0_9 = arith.constant 0 : index
    %10 = vector.load %arg6[%c0_8, %c0_9] : memref<2x32xf32, #tpu.memory_space<vmem>>, vector<2x32xf32>
    %c0_10 = arith.constant 0 : index
    %c0_11 = arith.constant 0 : index
    %11 = vector.load %arg7[%c0_10, %c0_11] : memref<2x32xf32, #tpu.memory_space<vmem>>, vector<2x32xf32>
    %12 = vector.extract_strided_slice %8 {offsets = [0, 0], sizes = [2, 128], strides = [1, 1]} : vector<16x128xf32> to vector<2x128xf32>
    %cst_12 = arith.constant dense<0.000000e+00> : vector<2x128xf32>
    %13 = tpu.matmul %10, %9, %cst_12 {dimension_numbers = #tpu.dot_dimension_numbers<[1], [0], [0], [1], [0, 0, 1, 1], [], []>} : vector<2x32xf32>, vector<32x128xf32>, vector<2x128xf32> -> vector<2x128xf32>
    %14 = arith.addf %12, %13 : vector<2x128xf32>
    %15 = vector.extract_strided_slice %14 {offsets = [0, 0], sizes = [2, 32], strides = [1, 1]} : vector<2x128xf32> to vector<2x32xf32>
    %16 = arith.negf %15 : vector<2x32xf32>
    %17 = math.exp %16 : vector<2x32xf32>
    %cst_13 = arith.constant 1.000000e+00 : f32
    %18 = vector.broadcast %cst_13 : f32 to vector<2x32xf32>
    %19 = arith.addf %18, %17 : vector<2x32xf32>
    %20 = arith.divf %18, %19 : vector<2x32xf32>
    %21 = vector.extract_strided_slice %14 {offsets = [0, 32], sizes = [2, 32], strides = [1, 1]} : vector<2x128xf32> to vector<2x32xf32>
    %22 = arith.negf %21 : vector<2x32xf32>
    %23 = math.exp %22 : vector<2x32xf32>
    %cst_14 = arith.constant 1.000000e+00 : f32
    %24 = vector.broadcast %cst_14 : f32 to vector<2x32xf32>
    %25 = arith.addf %24, %23 : vector<2x32xf32>
    %26 = arith.divf %24, %25 : vector<2x32xf32>
    %27 = vector.extract_strided_slice %14 {offsets = [0, 64], sizes = [2, 32], strides = [1, 1]} : vector<2x128xf32> to vector<2x32xf32>
    %28 = math.tanh %27 : vector<2x32xf32>
    %29 = vector.extract_strided_slice %14 {offsets = [0, 96], sizes = [2, 32], strides = [1, 1]} : vector<2x128xf32> to vector<2x32xf32>
    %30 = arith.negf %29 : vector<2x32xf32>
    %31 = math.exp %30 : vector<2x32xf32>
    %cst_15 = arith.constant 1.000000e+00 : f32
    %32 = vector.broadcast %cst_15 : f32 to vector<2x32xf32>
    %33 = arith.addf %32, %31 : vector<2x32xf32>
    %34 = arith.divf %32, %33 : vector<2x32xf32>
    %35 = arith.mulf %26, %11 : vector<2x32xf32>
    %36 = arith.mulf %20, %28 : vector<2x32xf32>
    %37 = arith.addf %35, %36 : vector<2x32xf32>
    %38 = math.tanh %37 : vector<2x32xf32>
    %39 = arith.mulf %34, %38 : vector<2x32xf32>
    %c0_16 = arith.constant 0 : index
    %c0_17 = arith.constant 0 : index
    %40 = vector.load %arg5[%c0_16, %c0_17] : memref<16x32xf32, #tpu.memory_space<vmem>>, vector<2x32xf32>
    tpu.vector_store %arg5[%c0_16, %c0_17], %39 {strides = array<i32>} : memref<16x32xf32, #tpu.memory_space<vmem>>, vector<2x32xf32>,
    %41 = vector.extract_strided_slice %8 {offsets = [2, 0], sizes = [2, 128], strides = [1, 1]} : vector<16x128xf32> to vector<2x128xf32>
    %cst_18 = arith.constant dense<0.000000e+00> : vector<2x128xf32>
    %42 = tpu.matmul %39, %9, %cst_18 {dimension_numbers = #tpu.dot_dimension_numbers<[1], [0], [0], [1], [0, 0, 1, 1], [], []>} : vector<2x32xf32>, vector<32x128xf32>, vector<2x128xf32> -> vector<2x128xf32>
    %43 = arith.addf %41, %42 : vector<2x128xf32>
    %44 = vector.extract_strided_slice %43 {offsets = [0, 0], sizes = [2, 32], strides = [1, 1]} : vector<2x128xf32> to vector<2x32xf32>
    %45 = arith.negf %44 : vector<2x32xf32>
    %46 = math.exp %45 : vector<2x32xf32>
    %cst_19 = arith.constant 1.000000e+00 : f32
    %47 = vector.broadcast %cst_19 : f32 to vector<2x32xf32>
    %48 = arith.addf %47, %46 : vector<2x32xf32>
    %49 = arith.divf %47, %48 : vector<2x32xf32>
    %50 = vector.extract_strided_slice %43 {offsets = [0, 32], sizes = [2, 32], strides = [1, 1]} : vector<2x128xf32> to vector<2x32xf32>
    %51 = arith.negf %50 : vector<2x32xf32>
    %52 = math.exp %51 : vector<2x32xf32>
    %cst_20 = arith.constant 1.000000e+00 : f32
    %53 = vector.broadcast %cst_20 : f32 to vector<2x32xf32>
    %54 = arith.addf %53, %52 : vector<2x32xf32>
    %55 = arith.divf %53, %54 : vector<2x32xf32>
    %56 = vector.extract_strided_slice %43 {offsets = [0, 64], sizes = [2, 32], strides = [1, 1]} : vector<2x128xf32> to vector<2x32xf32>
    %57 = math.tanh %56 : vector<2x32xf32>
    %58 = vector.extract_strided_slice %43 {offsets = [0, 96], sizes = [2, 32], strides = [1, 1]} : vector<2x128xf32> to vector<2x32xf32>
    %59 = arith.negf %58 : vector<2x32xf32>
    %60 = math.exp %59 : vector<2x32xf32>
    %cst_21 = arith.constant 1.000000e+00 : f32
    %61 = vector.broadcast %cst_21 : f32 to vector<2x32xf32>
    %62 = arith.addf %61, %60 : vector<2x32xf32>
    %63 = arith.divf %61, %62 : vector<2x32xf32>
    %64 = arith.mulf %55, %37 : vector<2x32xf32>
    %65 = arith.mulf %49, %57 : vector<2x32xf32>
    %66 = arith.addf %64, %65 : vector<2x32xf32>
    %67 = math.tanh %66 : vector<2x32xf32>
    %68 = arith.mulf %63, %67 : vector<2x32xf32>
    %c2 = arith.constant 2 : index
    %c0_22 = arith.constant 0 : index
    %69 = vector.load %arg5[%c2, %c0_22] : memref<16x32xf32, #tpu.memory_space<vmem>>, vector<2x32xf32>
    tpu.vector_store %arg5[%c2, %c0_22], %68 {strides = array<i32>} : memref<16x32xf32, #tpu.memory_space<vmem>>, vector<2x32xf32>,
    %70 = vector.extract_strided_slice %8 {offsets = [4, 0], sizes = [2, 128], strides = [1, 1]} : vector<16x128xf32> to vector<2x128xf32>
    %cst_23 = arith.constant dense<0.000000e+00> : vector<2x128xf32>
    %71 = tpu.matmul %68, %9, %cst_23 {dimension_numbers = #tpu.dot_dimension_numbers<[1], [0], [0], [1], [0, 0, 1, 1], [], []>} : vector<2x32xf32>, vector<32x128xf32>, vector<2x128xf32> -> vector<2x128xf32>
    %72 = arith.addf %70, %71 : vector<2x128xf32>
    %73 = vector.extract_strided_slice %72 {offsets = [0, 0], sizes = [2, 32], strides = [1, 1]} : vector<2x128xf32> to vector<2x32xf32>
    %74 = arith.negf %73 : vector<2x32xf32>
    %75 = math.exp %74 : vector<2x32xf32>
    %cst_24 = arith.constant 1.000000e+00 : f32
    %76 = vector.broadcast %cst_24 : f32 to vector<2x32xf32>
    %77 = arith.addf %76, %75 : vector<2x32xf32>
    %78 = arith.divf %76, %77 : vector<2x32xf32>
    %79 = vector.extract_strided_slice %72 {offsets = [0, 32], sizes = [2, 32], strides = [1, 1]} : vector<2x128xf32> to vector<2x32xf32>
    %80 = arith.negf %79 : vector<2x32xf32>
    %81 = math.exp %80 : vector<2x32xf32>
    %cst_25 = arith.constant 1.000000e+00 : f32
    %82 = vector.broadcast %cst_25 : f32 to vector<2x32xf32>
    %83 = arith.addf %82, %81 : vector<2x32xf32>
    %84 = arith.divf %82, %83 : vector<2x32xf32>
    %85 = vector.extract_strided_slice %72 {offsets = [0, 64], sizes = [2, 32], strides = [1, 1]} : vector<2x128xf32> to vector<2x32xf32>
    %86 = math.tanh %85 : vector<2x32xf32>
    %87 = vector.extract_strided_slice %72 {offsets = [0, 96], sizes = [2, 32], strides = [1, 1]} : vector<2x128xf32> to vector<2x32xf32>
    %88 = arith.negf %87 : vector<2x32xf32>
    %89 = math.exp %88 : vector<2x32xf32>
    %cst_26 = arith.constant 1.000000e+00 : f32
    %90 = vector.broadcast %cst_26 : f32 to vector<2x32xf32>
    %91 = arith.addf %90, %89 : vector<2x32xf32>
    %92 = arith.divf %90, %91 : vector<2x32xf32>
    %93 = arith.mulf %84, %66 : vector<2x32xf32>
    %94 = arith.mulf %78, %86 : vector<2x32xf32>
    %95 = arith.addf %93, %94 : vector<2x32xf32>
    %96 = math.tanh %95 : vector<2x32xf32>
    %97 = arith.mulf %92, %96 : vector<2x32xf32>
    %c4 = arith.constant 4 : index
    %c0_27 = arith.constant 0 : index
    %98 = vector.load %arg5[%c4, %c0_27] : memref<16x32xf32, #tpu.memory_space<vmem>>, vector<2x32xf32>
    tpu.vector_store %arg5[%c4, %c0_27], %97 {strides = array<i32>} : memref<16x32xf32, #tpu.memory_space<vmem>>, vector<2x32xf32>,
    %99 = vector.extract_strided_slice %8 {offsets = [6, 0], sizes = [2, 128], strides = [1, 1]} : vector<16x128xf32> to vector<2x128xf32>
    %cst_28 = arith.constant dense<0.000000e+00> : vector<2x128xf32>
    %100 = tpu.matmul %97, %9, %cst_28 {dimension_numbers = #tpu.dot_dimension_numbers<[1], [0], [0], [1], [0, 0, 1, 1], [], []>} : vector<2x32xf32>, vector<32x128xf32>, vector<2x128xf32> -> vector<2x128xf32>
    %101 = arith.addf %99, %100 : vector<2x128xf32>
    %102 = vector.extract_strided_slice %101 {offsets = [0, 0], sizes = [2, 32], strides = [1, 1]} : vector<2x128xf32> to vector<2x32xf32>
    %103 = arith.negf %102 : vector<2x32xf32>
    %104 = math.exp %103 : vector<2x32xf32>
    %cst_29 = arith.constant 1.000000e+00 : f32
    %105 = vector.broadcast %cst_29 : f32 to vector<2x32xf32>
    %106 = arith.addf %105, %104 : vector<2x32xf32>
    %107 = arith.divf %105, %106 : vector<2x32xf32>
    %108 = vector.extract_strided_slice %101 {offsets = [0, 32], sizes = [2, 32], strides = [1, 1]} : vector<2x128xf32> to vector<2x32xf32>
    %109 = arith.negf %108 : vector<2x32xf32>
    %110 = math.exp %109 : vector<2x32xf32>
    %cst_30 = arith.constant 1.000000e+00 : f32
    %111 = vector.broadcast %cst_30 : f32 to vector<2x32xf32>
    %112 = arith.addf %111, %110 : vector<2x32xf32>
    %113 = arith.divf %111, %112 : vector<2x32xf32>
    %114 = vector.extract_strided_slice %101 {offsets = [0, 64], sizes = [2, 32], strides = [1, 1]} : vector<2x128xf32> to vector<2x32xf32>
    %115 = math.tanh %114 : vector<2x32xf32>
    %116 = vector.extract_strided_slice %101 {offsets = [0, 96], sizes = [2, 32], strides = [1, 1]} : vector<2x128xf32> to vector<2x32xf32>
    %117 = arith.negf %116 : vector<2x32xf32>
    %118 = math.exp %117 : vector<2x32xf32>
    %cst_31 = arith.constant 1.000000e+00 : f32
    %119 = vector.broadcast %cst_31 : f32 to vector<2x32xf32>
    %120 = arith.addf %119, %118 : vector<2x32xf32>
    %121 = arith.divf %119, %120 : vector<2x32xf32>
    %122 = arith.mulf %113, %95 : vector<2x32xf32>
    %123 = arith.mulf %107, %115 : vector<2x32xf32>
    %124 = arith.addf %122, %123 : vector<2x32xf32>
    %125 = math.tanh %124 : vector<2x32xf32>
    %126 = arith.mulf %121, %125 : vector<2x32xf32>
    %c6 = arith.constant 6 : index
    %c0_32 = arith.constant 0 : index
    %127 = vector.load %arg5[%c6, %c0_32] : memref<16x32xf32, #tpu.memory_space<vmem>>, vector<2x32xf32>
    tpu.vector_store %arg5[%c6, %c0_32], %126 {strides = array<i32>} : memref<16x32xf32, #tpu.memory_space<vmem>>, vector<2x32xf32>,
    %128 = vector.extract_strided_slice %8 {offsets = [8, 0], sizes = [2, 128], strides = [1, 1]} : vector<16x128xf32> to vector<2x128xf32>
    %cst_33 = arith.constant dense<0.000000e+00> : vector<2x128xf32>
    %129 = tpu.matmul %126, %9, %cst_33 {dimension_numbers = #tpu.dot_dimension_numbers<[1], [0], [0], [1], [0, 0, 1, 1], [], []>} : vector<2x32xf32>, vector<32x128xf32>, vector<2x128xf32> -> vector<2x128xf32>
    %130 = arith.addf %128, %129 : vector<2x128xf32>
    %131 = vector.extract_strided_slice %130 {offsets = [0, 0], sizes = [2, 32], strides = [1, 1]} : vector<2x128xf32> to vector<2x32xf32>
    %132 = arith.negf %131 : vector<2x32xf32>
    %133 = math.exp %132 : vector<2x32xf32>
    %cst_34 = arith.constant 1.000000e+00 : f32
    %134 = vector.broadcast %cst_34 : f32 to vector<2x32xf32>
    %135 = arith.addf %134, %133 : vector<2x32xf32>
    %136 = arith.divf %134, %135 : vector<2x32xf32>
    %137 = vector.extract_strided_slice %130 {offsets = [0, 32], sizes = [2, 32], strides = [1, 1]} : vector<2x128xf32> to vector<2x32xf32>
    %138 = arith.negf %137 : vector<2x32xf32>
    %139 = math.exp %138 : vector<2x32xf32>
    %cst_35 = arith.constant 1.000000e+00 : f32
    %140 = vector.broadcast %cst_35 : f32 to vector<2x32xf32>
    %141 = arith.addf %140, %139 : vector<2x32xf32>
    %142 = arith.divf %140, %141 : vector<2x32xf32>
    %143 = vector.extract_strided_slice %130 {offsets = [0, 64], sizes = [2, 32], strides = [1, 1]} : vector<2x128xf32> to vector<2x32xf32>
    %144 = math.tanh %143 : vector<2x32xf32>
    %145 = vector.extract_strided_slice %130 {offsets = [0, 96], sizes = [2, 32], strides = [1, 1]} : vector<2x128xf32> to vector<2x32xf32>
    %146 = arith.negf %145 : vector<2x32xf32>
    %147 = math.exp %146 : vector<2x32xf32>
    %cst_36 = arith.constant 1.000000e+00 : f32
    %148 = vector.broadcast %cst_36 : f32 to vector<2x32xf32>
    %149 = arith.addf %148, %147 : vector<2x32xf32>
    %150 = arith.divf %148, %149 : vector<2x32xf32>
    %151 = arith.mulf %142, %124 : vector<2x32xf32>
    %152 = arith.mulf %136, %144 : vector<2x32xf32>
    %153 = arith.addf %151, %152 : vector<2x32xf32>
    %154 = math.tanh %153 : vector<2x32xf32>
    %155 = arith.mulf %150, %154 : vector<2x32xf32>
    %c8 = arith.constant 8 : index
    %c0_37 = arith.constant 0 : index
    %156 = vector.load %arg5[%c8, %c0_37] : memref<16x32xf32, #tpu.memory_space<vmem>>, vector<2x32xf32>
    tpu.vector_store %arg5[%c8, %c0_37], %155 {strides = array<i32>} : memref<16x32xf32, #tpu.memory_space<vmem>>, vector<2x32xf32>,
    %157 = vector.extract_strided_slice %8 {offsets = [10, 0], sizes = [2, 128], strides = [1, 1]} : vector<16x128xf32> to vector<2x128xf32>
    %cst_38 = arith.constant dense<0.000000e+00> : vector<2x128xf32>
    %158 = tpu.matmul %155, %9, %cst_38 {dimension_numbers = #tpu.dot_dimension_numbers<[1], [0], [0], [1], [0, 0, 1, 1], [], []>} : vector<2x32xf32>, vector<32x128xf32>, vector<2x128xf32> -> vector<2x128xf32>
    %159 = arith.addf %157, %158 : vector<2x128xf32>
    %160 = vector.extract_strided_slice %159 {offsets = [0, 0], sizes = [2, 32], strides = [1, 1]} : vector<2x128xf32> to vector<2x32xf32>
    %161 = arith.negf %160 : vector<2x32xf32>
    %162 = math.exp %161 : vector<2x32xf32>
    %cst_39 = arith.constant 1.000000e+00 : f32
    %163 = vector.broadcast %cst_39 : f32 to vector<2x32xf32>
    %164 = arith.addf %163, %162 : vector<2x32xf32>
    %165 = arith.divf %163, %164 : vector<2x32xf32>
    %166 = vector.extract_strided_slice %159 {offsets = [0, 32], sizes = [2, 32], strides = [1, 1]} : vector<2x128xf32> to vector<2x32xf32>
    %167 = arith.negf %166 : vector<2x32xf32>
    %168 = math.exp %167 : vector<2x32xf32>
    %cst_40 = arith.constant 1.000000e+00 : f32
    %169 = vector.broadcast %cst_40 : f32 to vector<2x32xf32>
    %170 = arith.addf %169, %168 : vector<2x32xf32>
    %171 = arith.divf %169, %170 : vector<2x32xf32>
    %172 = vector.extract_strided_slice %159 {offsets = [0, 64], sizes = [2, 32], strides = [1, 1]} : vector<2x128xf32> to vector<2x32xf32>
    %173 = math.tanh %172 : vector<2x32xf32>
    %174 = vector.extract_strided_slice %159 {offsets = [0, 96], sizes = [2, 32], strides = [1, 1]} : vector<2x128xf32> to vector<2x32xf32>
    %175 = arith.negf %174 : vector<2x32xf32>
    %176 = math.exp %175 : vector<2x32xf32>
    %cst_41 = arith.constant 1.000000e+00 : f32
    %177 = vector.broadcast %cst_41 : f32 to vector<2x32xf32>
    %178 = arith.addf %177, %176 : vector<2x32xf32>
    %179 = arith.divf %177, %178 : vector<2x32xf32>
    %180 = arith.mulf %171, %153 : vector<2x32xf32>
    %181 = arith.mulf %165, %173 : vector<2x32xf32>
    %182 = arith.addf %180, %181 : vector<2x32xf32>
    %183 = math.tanh %182 : vector<2x32xf32>
    %184 = arith.mulf %179, %183 : vector<2x32xf32>
    %c10 = arith.constant 10 : index
    %c0_42 = arith.constant 0 : index
    %185 = vector.load %arg5[%c10, %c0_42] : memref<16x32xf32, #tpu.memory_space<vmem>>, vector<2x32xf32>
    tpu.vector_store %arg5[%c10, %c0_42], %184 {strides = array<i32>} : memref<16x32xf32, #tpu.memory_space<vmem>>, vector<2x32xf32>,
    %186 = vector.extract_strided_slice %8 {offsets = [12, 0], sizes = [2, 128], strides = [1, 1]} : vector<16x128xf32> to vector<2x128xf32>
    %cst_43 = arith.constant dense<0.000000e+00> : vector<2x128xf32>
    %187 = tpu.matmul %184, %9, %cst_43 {dimension_numbers = #tpu.dot_dimension_numbers<[1], [0], [0], [1], [0, 0, 1, 1], [], []>} : vector<2x32xf32>, vector<32x128xf32>, vector<2x128xf32> -> vector<2x128xf32>
    %188 = arith.addf %186, %187 : vector<2x128xf32>
    %189 = vector.extract_strided_slice %188 {offsets = [0, 0], sizes = [2, 32], strides = [1, 1]} : vector<2x128xf32> to vector<2x32xf32>
    %190 = arith.negf %189 : vector<2x32xf32>
    %191 = math.exp %190 : vector<2x32xf32>
    %cst_44 = arith.constant 1.000000e+00 : f32
    %192 = vector.broadcast %cst_44 : f32 to vector<2x32xf32>
    %193 = arith.addf %192, %191 : vector<2x32xf32>
    %194 = arith.divf %192, %193 : vector<2x32xf32>
    %195 = vector.extract_strided_slice %188 {offsets = [0, 32], sizes = [2, 32], strides = [1, 1]} : vector<2x128xf32> to vector<2x32xf32>
    %196 = arith.negf %195 : vector<2x32xf32>
    %197 = math.exp %196 : vector<2x32xf32>
    %cst_45 = arith.constant 1.000000e+00 : f32
    %198 = vector.broadcast %cst_45 : f32 to vector<2x32xf32>
    %199 = arith.addf %198, %197 : vector<2x32xf32>
    %200 = arith.divf %198, %199 : vector<2x32xf32>
    %201 = vector.extract_strided_slice %188 {offsets = [0, 64], sizes = [2, 32], strides = [1, 1]} : vector<2x128xf32> to vector<2x32xf32>
    %202 = math.tanh %201 : vector<2x32xf32>
    %203 = vector.extract_strided_slice %188 {offsets = [0, 96], sizes = [2, 32], strides = [1, 1]} : vector<2x128xf32> to vector<2x32xf32>
    %204 = arith.negf %203 : vector<2x32xf32>
    %205 = math.exp %204 : vector<2x32xf32>
    %cst_46 = arith.constant 1.000000e+00 : f32
    %206 = vector.broadcast %cst_46 : f32 to vector<2x32xf32>
    %207 = arith.addf %206, %205 : vector<2x32xf32>
    %208 = arith.divf %206, %207 : vector<2x32xf32>
    %209 = arith.mulf %200, %182 : vector<2x32xf32>
    %210 = arith.mulf %194, %202 : vector<2x32xf32>
    %211 = arith.addf %209, %210 : vector<2x32xf32>
    %212 = math.tanh %211 : vector<2x32xf32>
    %213 = arith.mulf %208, %212 : vector<2x32xf32>
    %c12 = arith.constant 12 : index
    %c0_47 = arith.constant 0 : index
    %214 = vector.load %arg5[%c12, %c0_47] : memref<16x32xf32, #tpu.memory_space<vmem>>, vector<2x32xf32>
    tpu.vector_store %arg5[%c12, %c0_47], %213 {strides = array<i32>} : memref<16x32xf32, #tpu.memory_space<vmem>>, vector<2x32xf32>,
    %215 = vector.extract_strided_slice %8 {offsets = [14, 0], sizes = [2, 128], strides = [1, 1]} : vector<16x128xf32> to vector<2x128xf32>
    %cst_48 = arith.constant dense<0.000000e+00> : vector<2x128xf32>
    %216 = tpu.matmul %213, %9, %cst_48 {dimension_numbers = #tpu.dot_dimension_numbers<[1], [0], [0], [1], [0, 0, 1, 1], [], []>} : vector<2x32xf32>, vector<32x128xf32>, vector<2x128xf32> -> vector<2x128xf32>
    %217 = arith.addf %215, %216 : vector<2x128xf32>
    %218 = vector.extract_strided_slice %217 {offsets = [0, 0], sizes = [2, 32], strides = [1, 1]} : vector<2x128xf32> to vector<2x32xf32>
    %219 = arith.negf %218 : vector<2x32xf32>
    %220 = math.exp %219 : vector<2x32xf32>
    %cst_49 = arith.constant 1.000000e+00 : f32
    %221 = vector.broadcast %cst_49 : f32 to vector<2x32xf32>
    %222 = arith.addf %221, %220 : vector<2x32xf32>
    %223 = arith.divf %221, %222 : vector<2x32xf32>
    %224 = vector.extract_strided_slice %217 {offsets = [0, 32], sizes = [2, 32], strides = [1, 1]} : vector<2x128xf32> to vector<2x32xf32>
    %225 = arith.negf %224 : vector<2x32xf32>
    %226 = math.exp %225 : vector<2x32xf32>
    %cst_50 = arith.constant 1.000000e+00 : f32
    %227 = vector.broadcast %cst_50 : f32 to vector<2x32xf32>
    %228 = arith.addf %227, %226 : vector<2x32xf32>
    %229 = arith.divf %227, %228 : vector<2x32xf32>
    %230 = vector.extract_strided_slice %217 {offsets = [0, 64], sizes = [2, 32], strides = [1, 1]} : vector<2x128xf32> to vector<2x32xf32>
    %231 = math.tanh %230 : vector<2x32xf32>
    %232 = vector.extract_strided_slice %217 {offsets = [0, 96], sizes = [2, 32], strides = [1, 1]} : vector<2x128xf32> to vector<2x32xf32>
    %233 = arith.negf %232 : vector<2x32xf32>
    %234 = math.exp %233 : vector<2x32xf32>
    %cst_51 = arith.constant 1.000000e+00 : f32
    %235 = vector.broadcast %cst_51 : f32 to vector<2x32xf32>
    %236 = arith.addf %235, %234 : vector<2x32xf32>
    %237 = arith.divf %235, %236 : vector<2x32xf32>
    %238 = arith.mulf %229, %211 : vector<2x32xf32>
    %239 = arith.mulf %223, %231 : vector<2x32xf32>
    %240 = arith.addf %238, %239 : vector<2x32xf32>
    %241 = math.tanh %240 : vector<2x32xf32>
    %242 = arith.mulf %237, %241 : vector<2x32xf32>
    %c14 = arith.constant 14 : index
    %c0_52 = arith.constant 0 : index
    %243 = vector.load %arg5[%c14, %c0_52] : memref<16x32xf32, #tpu.memory_space<vmem>>, vector<2x32xf32>
    tpu.vector_store %arg5[%c14, %c0_52], %242 {strides = array<i32>} : memref<16x32xf32, #tpu.memory_space<vmem>>, vector<2x32xf32>,
    %c0_53 = arith.constant 0 : index
    %c0_54 = arith.constant 0 : index
    %244 = vector.load %arg6[%c0_53, %c0_54] : memref<2x32xf32, #tpu.memory_space<vmem>>, vector<2x32xf32>
    tpu.vector_store %arg6[%c0_53, %c0_54], %242 {strides = array<i32>} : memref<2x32xf32, #tpu.memory_space<vmem>>, vector<2x32xf32>,
    %c0_55 = arith.constant 0 : index
    %c0_56 = arith.constant 0 : index
    %245 = vector.load %arg7[%c0_55, %c0_56] : memref<2x32xf32, #tpu.memory_space<vmem>>, vector<2x32xf32>
    tpu.vector_store %arg7[%c0_55, %c0_56], %240 {strides = array<i32>} : memref<2x32xf32, #tpu.memory_space<vmem>>, vector<2x32xf32>,
    return
  }
  func.func @transform_0(%arg0: i32) -> (i32, i32) {
    %c0_i32 = arith.constant 0 : i32
    %c0_i32_0 = arith.constant 0 : i32
    return %arg0, %c0_i32 : i32, i32
  }
  func.func @transform_1(%arg0: i32) -> (i32, i32) {
    %c0_i32 = arith.constant 0 : i32
    %c0_i32_0 = arith.constant 0 : i32
    %c0_i32_1 = arith.constant 0 : i32
    return %c0_i32, %c0_i32_0 : i32, i32
  }
  func.func @transform_2(%arg0: i32) -> (i32, i32) {
    %c0_i32 = arith.constant 0 : i32
    %c0_i32_0 = arith.constant 0 : i32
    %c0_i32_1 = arith.constant 0 : i32
    return %c0_i32, %c0_i32_0 : i32, i32
  }
  func.func @transform_3(%arg0: i32) -> (i32, i32) {
    %c0_i32 = arith.constant 0 : i32
    %c0_i32_0 = arith.constant 0 : i32
    %c0_i32_1 = arith.constant 0 : i32
    return %c0_i32, %c0_i32_0 : i32, i32
  }
  func.func @transform_4(%arg0: i32) -> (i32, i32) {
    %c0_i32 = arith.constant 0 : i32
    %c0_i32_0 = arith.constant 0 : i32
    return %arg0, %c0_i32 : i32, i32
  }
}

</mosaic_0001>

<bundles_post_ra>
// kernel: tpu_custom_call.1
= control target key start
LH: loop header
LB: loop body
LE: loop exit
PB: predicated region body
PF: predicated region fallthrough
CT: control target
= control target key end

     0   :  { %9 = vsyncpa [#allocation5], 0  ;;  %s1977_s0 = inlined_call_operand.vmem [shape: f32[32,16], index: 0, kind: input, shape index: {}]   ;;  %s1978_s1 = inlined_call_operand.vmem [shape: f32[16,128], index: 1, kind: input, shape index: {}]   ;;  %s1979_s2 = inlined_call_operand.vmem [shape: f32[32,128], index: 2, kind: input, shape index: {}]   ;;  %s1980_s3 = inlined_call_operand.vmem [shape: f32[1,128], index: 3, kind: input, shape index: {}]   ;;  %s1981_s4 = inlined_call_operand.hbm [shape: f32[32,32], index: 4, kind: output, shape index: {}]  }
   0x1   :  { %11 = vsyncpa [#allocation5 + $0x1], 0  ;;  %s1702_s15 = smov 0   ;;  %s1704_s16 = smov 0  }
   0x2   :  { %s1706_s17 = smov 0   ;;  %s1708_s18 = smov 0  }
   0x3 LB: > { %s1723_s19 = sadd.s32 4294967295, %s1665_s18   ;;  %s1267_s20 = sadd.s32 4294967294, %s1665_s18   ;;  %s1665_s18 = sphi %s1708_s18, %s1987_s18   ;;  %s1661_s17 = sphi %s1706_s17, %s1986_s17   ;;  %s1657_s16 = sphi %s1704_s16, %s1985_s16   ;;  %s1653_s15 = sphi %s1702_s15, %s1984_s15  }
   0x4   : > { %s1727_s21 = sadd.s32 1, %s1665_s18   ;;  %s113_s22 = sadd.s32 1, %s1661_s17 }
   0x5   : > { %s110_s23 = ssub.s32 %s1665_s18, %s1727_s21  ;;  %p123_p0 = scmp.ne.s32.totalorder %s1661_s17, %s1657_s16 }
   0x6   : > { %p111_p1 = scmp.eq.s32.totalorder %s110_s23, 0  ;;  %p124_p2 = scmp.eq.s32.totalorder %s1723_s19, 1 }
   0x7   : > { %p129_p3 = scmp.ne.s32.totalorder %s1657_s16, %s1653_s15  ;;  %p130_p4 = scmp.eq.s32.totalorder %s1267_s20, 1 }
   0x8   : > { %s1738_s24 = scalar_select %p111_p1, %s1661_s17, %s113_s22  }
   0x9   : > { %p1740_p5 = por %p124_p2, %p123_p0  ;;  %p1744_p6 = por %p130_p4, %p129_p3 }
   0xa   : > { %p1270_p7 = scmp.ge.s32.totalorder %s1665_s18, 1  ;;  %p166_p8 = scmp.lt.s32.totalorder %s1665_s18, 3 }
   0xc   : > { %p167_p9 = pnand %p1270_p7, %p166_p8 }
   0xd   : > { %s189_s27 = sand.u32 (!%p167_p9), 1, %s1657_s16   ;;  %s1272_s28 = sshll.u32 (!%p167_p9), %s1723_s19, 1 }
   0xe   : > { %170 = sbr.rel (%p167_p9) target bundleno = 5692 (0x163c), region = 36  ;;  %s1271_s29 = sshll.u32 (!%p167_p9), %s189_s27, 4 }
   0xf   : > { %p193_p10 = scmp.lt.s32.totalorder (!%p167_p9), %s1272_s28, 3  ;;  %s1757_s8 = scalar_lea.vmem (!%p167_p9), [#allocation4], %s1271_s29 }
  0x10   : > { %p1274_p11 = scmp.ne.s32.totalorder (!%p167_p9), %s1723_s19, 0 }
  0x15   : > { %s1989_s28 = smov (!%p193_p10, %s1272_s28), 3  ;;  %202 = sbr.rel (%p1274_p11) target bundleno = 28 (0x1c), region = 40 }
  0x16   : > { %s1273_s30 = sshll.u32 %s1989_s28, 3  ;;  %vm203_vm0 = vcmask (!%p1274_p11), 254976   ;;  %v1667_v0 = vmov (!%p1274_p11), 0.0  }
  0x17   : > { %s196_s7 = scalar_lea.vmem %s1977_s0, %s1273_s30  ;;  %204 = vst.msk [vmem:[#allocation2] sm:$0x3] (!%p1274_p11), %vm203_vm0, %v1667_v0  ;;  %205 = vst.msk [vmem:[#allocation3] sm:$0x3] (!%p1274_p11), %vm203_vm0, %v1667_v0 }
  0x1c PF: > { %v208_v1 = vld [vmem:[%s1978_s1] sm:$0xff]  ;;  %v209_v2 = vld [vmem:[%s1978_s1 + $0x8] sm:$0xff]  ;;  %vm217_vm1 = vcmask 130048   ;;  %v1668_v4 = vmov 0.0|0.0   ;;  %v301_v9 = vld [vmem:[%s1979_s2 + $0x10] sm:$0xff]  ;;  %vm1669_vm2 = vmmov 0  }
  0x1d   : > { %v299_v3 = vld [vmem:[%s1979_s2] sm:$0xff]  ;;  %1443 = vmatprep.subr.bf16.mxu1 %v1668_v4  ;;  %v1439_v5 = vpack.c.bf16 %v209_v2, %v208_v1  ;;  %v300_v6 = vld [vmem:[%s1979_s2 + $0x8] sm:$0xff]  ;;  %v302_v10 = vld [vmem:[%s1979_s2 + $0x18] sm:$0xff]  ;;  %v1670_v11 = vmov 0.0   ;;  %vm305_vm3 = vcmask 261120   ;;  %s1672_s9 = smov 32  }
  0x1e   : > { %v206_v7 = vld [vmem:[%s196_s7] sm:$0xff]  ;;  %v1773_v8 = vpack.c.bf16 %v300_v6, %v299_v3  ;;  %1359 = vmatprep.mubr.msk.f32.mxu1 %vm1669_vm2, %v1670_v11  ;;  %v207_v12 = vld [vmem:[%s196_s7 + $0x8] sm:$0xff]  ;;  %v1785_v13 = vpack.c.bf16 %v302_v10, %v301_v9  ;;  %s1671_s7 = smov 64   ;;  %vm412_vm4 = vcmask 254976   ;;  %vm521_vm5 = vcmask 257026   ;;  %s1673_s10 = smov 96  }
  0x1f   : > { %1348 = vmatprep.mubr.msk.f32.mxu0 %vm217_vm1, %v206_v7  ;;  %1440 = vmatprep.subr.bf16.mxu0 %v1439_v5  ;;  %v303_v14 = vld [vmem:[#allocation2] sm:$0x3]  ;;  %v304_v24 = vld [vmem:[#allocation3] sm:$0x3]  ;;  %vm745_vm6 = vcmask 261126   ;;  %vm633_vm7 = vcmask 259076  }
  0x20   : > { %1445 = vmatpush3.bf16.msra.mxu1 %v1773_v8  ;;  %1442 = vmatpush3.bf16.msra.mxu0 %v1439_v5  ;;  %v1275_v15 = vld [vmem:[%s1980_s3] ss:$0 sm:$0xff]  ;;  %s1299_s11 = sshll.u32 %s1723_s19, 8  ;;  %s1205_s12 = sshll.u32 %s1757_s8, 4  ;;  %s1929_s12 = int_to_ptr.vmem [resolvable:$true] %s1205_s12 }
  0x21   : > { %1446 = vmatprep.subr.bf16.mxu1 %v1668_v4  ;;  %1449 = vmatprep.subr.bf16.mxu0 %v1668_v4  ;;  %s1927_s20 = scalar_lea.hbm %s1981_s4, %s1299_s11  ;;  %s1936_s22 = scalar_lea.sflag [#allocation5], %s189_s27 }
  0x22   : > { %s1603_s19 = scalar_lea.vmem %s1929_s12, 256  ;;  %s1674_s23 = smov [#allocation4]  }
  0x23   : > { %1349 = vmatmul.mubr.msk.f32.vlgmr.msra.gmra.mrb[0].mxu0 %vm217_vm1, %v207_v12  ;;  %p1604_p12 = scmp.ne.s32.totalorder %s1929_s12, %s1603_s19  ;;  %s1607_s28 = sshll.u32 %s1674_s23, 4  ;;  %s1608_s28 = int_to_ptr.vmem [resolvable:$false] %s1607_s28 }
  0x24   : > { %1448 = vmatpush3.bf16.msra.mxu1 %v1785_v13  ;;  %1451 = vmatpush3.bf16.msra.mxu0 %v1773_v8  ;;  %s1609_s29 = scalar_lea.vmem %s1608_s28, 512  ;;  %p1610_p1 = scmp.lt.s32.totalorder %s1929_s12, %s1608_s28 }
  0x25   : > { %1452 = vmatprep.subr.bf16.mxu0 %v1668_v4  ;;  %1370 = vmatprep.mubr.msk.f32.mxu0 %vm1669_vm2, %v1670_v11  ;;  %p1605_p13 = pnand %p1604_p12, %p1740_p5  ;;  %p1611_p2 = scmp.lt.s32.totalorder %s1609_s29, %s1603_s19 }
  0x26   : > { %1455 = vmatprep.subr.bf16.mxu1 %v1668_v4 }
  0x27   : > { %1360 = vmatmul.mubr.msk.f32.vlgmr.msra.gmra.mrb[0].mxu1 %vm305_vm3, %v303_v14  ;;  %p1606_p0 = pneg %p1605_p13  ;;  %p1612_p3 = por %p1611_p2, %p1610_p1 }
  0x28   : > { %1454 = vmatpush3.bf16.msra.mxu0 %v1785_v13  ;;  %1457 = vmatpush3.bf16.msra.mxu1 %v1773_v8 }
  0x29   : > { %1458 = vmatprep.subr.bf16.mxu1 %v1668_v4  ;;  %1381 = vmatprep.mubr.msk.f32.mxu1 %vm1669_vm2, %v1670_v11  ;;  %p1613_p4 = pnand %p1612_p3, %p1606_p0 }
  0x2a   : > { %1461 = vmatprep.subr.bf16.mxu0 %v1668_v4 }
  0x2c   : > { %1460 = vmatpush3.bf16.msra.mxu1 %v1785_v13 }
  0x2d   : > { %1467 = vmatprep.subr.bf16.mxu1 %v1668_v4 }
  0xf6   : > { %v1350_v16 = vpop.f32.mrb[0].mxu0 }
  0xf7   : > { %v1808_v17 = vadd.f32 %v1350_v16, %v1275_v15  ;;  %v290_v18 = vpop.f32.mrb[1].mxu0 }
  0xf8   : > { %v1810_v19 = vadd.f32 %v1275_v15, %v290_v18 }
  0xfa   : > { %v375_v20 = vpop.f32.mrb[0].mxu1 }
  0xfb   : > { %v379_v21 = vadd.f32 %v375_v20, %v1810_v19  ;;  %v1361_v22 = vpop.f32.mrb[1].mxu1 }
  0xfd   : > { %1539 = vtanh.f32 %v379_v21  ;;  %v1279_v25 = vmul.f32 -1.442695, %v379_v21 }
  0xff   : > { %1541 = vpow2.f32 %v1279_v25 }
 0x107   : > { %v1540_v23 = vpop.eup %1539 }
 0x108   : > { %393 = vrot.lane.b32.xlu0 %v1540_v23, %s1671_s7 }
 0x109   : > { %v1542_v26 = vpop.eup %1541 }
 0x10a   : > { %v383_v27 = vadd.f32 1.0, %v1542_v26 }
 0x10c   : > { %388 = vrot.lane.b32.xlu0 %v304_v24, %s1672_s9  ;;  %1543 = vrcp.f32 %v383_v27 }
 0x116   : > { %v1544_v28 = vpop.eup %1543 }
 0x17a   : > { %v394_v29 = vpop.permute.xlu0 %393 }
 0x17b   : > { %v396_v30 = vmul.f32 %v1544_v28, %v394_v29 }
 0x17d   : > { %398 = vrot.lane.b32.xlu1 %v396_v30, %s1672_s9 }
 0x17e   : > { %v389_v31 = vpop.permute.xlu0 %388 }
 0x17f   : > { %v391_v32 = vmul.f32 %v1544_v28, %v389_v31 }
 0x1ef   : > { %v399_v33 = vpop.permute.xlu1 %398 }
 0x1f0   : > { %v401_v34 = vadd.f32 %v399_v33, %v391_v32 }
 0x1f2   : > { %1545 = vtanh.f32 %v401_v34  ;;  %v498_v50 = vrot.slane %v401_v34, 6 }
 0x1fc   : > { %v1546_v35 = vpop.eup %1545 }
 0x1fd   : > { %404 = vrot.lane.b32.xlu1 %v1546_v35, %s1671_s7 }
 0x26f   : > { %v405_v36 = vpop.permute.xlu1 %404 }
 0x270   : > { %v407_v37 = vmul.f32 %v1544_v28, %v405_v36 }
 0x272   : > { %409 = vrot.lane.b32.xlu0 %v407_v37, %s1672_s9 }
 0x2e4   : > { %v410_v38 = vpop.permute.xlu0 %409 }
 0x2e5   : > { %413 = vst.msk [vmem:[%s1757_s8] sm:$0x3] %vm412_vm4, %v410_v38  ;;  %1371 = vmatmul.mubr.msk.f32.vlgmr.msra.gmra.mrb[2].mxu0 %vm305_vm3, %v410_v38 }
 0x2e6   : > { %1463 = vmatpush3.bf16.msra.mxu0 %v1773_v8  ;;  %1392 = vmatprep.mubr.msk.f32.mxu0 %vm1669_vm2, %v1670_v11 }
 0x2e7   : > { %1464 = vmatprep.subr.bf16.mxu0 %v1668_v4 }
 0x2ea   : > { %1466 = vmatpush3.bf16.msra.mxu0 %v1785_v13 }
 0x2eb   : > { %1473 = vmatprep.subr.bf16.mxu0 %v1668_v4 }
 0x3b8   : > { %v482_v39 = vpop.f32.mrb[2].mxu0 }
 0x3b9   : > { %v487_v40 = vrot.slane %v482_v39, 6  ;;  %v1372_v41 = vpop.f32.mrb[3].mxu0 }
 0x3bb   : > { %v489_v42 = vadd.f32 %v487_v40, %v1810_v19 }
 0x3bd   : > { %1547 = vtanh.f32 %v489_v42  ;;  %v1281_v44 = vmul.f32 -1.442695, %v489_v42 }
 0x3bf   : > { %1549 = vpow2.f32 %v1281_v44 }
 0x3c7   : > { %v1548_v43 = vpop.eup %1547 }
 0x3c8   : > { %502 = vrot.lane.b32.xlu1 %v1548_v43, %s1671_s7 }
 0x3c9   : > { %v1550_v45 = vpop.eup %1549 }
 0x3ca   : > { %v493_v46 = vadd.f32 1.0, %v1550_v45 }
 0x3cc   : > { %1551 = vrcp.f32 %v493_v46 }
 0x3d6   : > { %v1552_v47 = vpop.eup %1551 }
 0x3d7   : > { %v500_v51 = vmul.f32 %v1552_v47, %v498_v50 }
 0x43a   : > { %v503_v48 = vpop.permute.xlu1 %502 }
 0x43b   : > { %v505_v49 = vmul.f32 %v1552_v47, %v503_v48 }
 0x43d   : > { %507 = vrot.lane.b32.xlu0 %v505_v49, %s1672_s9 }
 0x4af   : > { %v508_v52 = vpop.permute.xlu0 %507 }
 0x4b0   : > { %v510_v53 = vadd.f32 %v508_v52, %v500_v51 }
 0x4b2   : > { %1553 = vtanh.f32 %v510_v53  ;;  %v610_v7 = vrot.slane %v510_v53, 6 }
 0x4bc   : > { %v1554_v54 = vpop.eup %1553 }
 0x4bd   : > { %513 = vrot.lane.b32.xlu1 %v1554_v54, %s1671_s7 }
 0x52f   : > { %v514_v55 = vpop.permute.xlu1 %513 }
 0x530   : > { %v1831_v56 = vmul.f32 %v1552_v47, %v514_v55 }
 0x532   : > { %v523_v57 = vrot.slane %v1831_v56, 2 }
 0x534   : > { %524 = vrot.lane.b32.xlu0 %v523_v57, %s1672_s9 }
 0x5a6   : > { %v525_v58 = vpop.permute.xlu0 %524 }
 0x5a7   : > { %1382 = vmatmul.mubr.msk.f32.vlgmr.msra.gmra.mrb[2].mxu1 %vm305_vm3, %v525_v58 }
 0x5a8   : > { %1469 = vmatpush3.bf16.msra.mxu1 %v1773_v8  ;;  %1403 = vmatprep.mubr.msk.f32.mxu1 %vm1669_vm2, %v1670_v11 }
 0x5a9   : > { %1470 = vmatprep.subr.bf16.mxu1 %v1668_v4 }
 0x5ac   : > { %1472 = vmatpush3.bf16.msra.mxu1 %v1785_v13 }
 0x5ad   : > { %1479 = vmatprep.subr.bf16.mxu1 %v1668_v4 }
 0x67a   : > { %v594_v59 = vpop.f32.mrb[2].mxu1 }
 0x67b   : > { %v599_v60 = vrot.slane %v594_v59, 4  ;;  %v1383_v61 = vpop.f32.mrb[3].mxu1 }
 0x67d   : > { %v601_v62 = vadd.f32 %v599_v60, %v1810_v19 }
 0x67f   : > { %1555 = vtanh.f32 %v601_v62  ;;  %v1283_v0 = vmul.f32 -1.442695, %v601_v62 }
 0x681   : > { %1557 = vpow2.f32 %v1283_v0 }
 0x689   : > { %v1556_v63 = vpop.eup %1555 }
 0x68a   : > { %614 = vrot.lane.b32.xlu1 %v1556_v63, %s1671_s7 }
 0x68b   : > { %v1558_v1 = vpop.eup %1557 }
 0x68c   : > { %v605_v2 = vadd.f32 1.0, %v1558_v1 }
 0x68e   : > { %1559 = vrcp.f32 %v605_v2 }
 0x698   : > { %v1560_v3 = vpop.eup %1559 }
 0x699   : > { %v612_v9 = vmul.f32 %v1560_v3, %v610_v7 }
 0x6fc   : > { %v615_v5 = vpop.permute.xlu1 %614 }
 0x6fd   : > { %v617_v6 = vmul.f32 %v1560_v3, %v615_v5 }
 0x6ff   : > { %619 = vrot.lane.b32.xlu0 %v617_v6, %s1672_s9 }
 0x771   : > { %v620_v10 = vpop.permute.xlu0 %619 }
 0x772   : > { %v622_v12 = vadd.f32 %v620_v10, %v612_v9 }
 0x774   : > { %1561 = vtanh.f32 %v622_v12  ;;  %v722_v32 = vrot.slane %v622_v12, 6 }
 0x77e   : > { %v1562_v14 = vpop.eup %1561 }
 0x77f   : > { %625 = vrot.lane.b32.xlu1 %v1562_v14, %s1671_s7 }
 0x7f1   : > { %v626_v15 = vpop.permute.xlu1 %625 }
 0x7f2   : > { %v1846_v16 = vmul.f32 %v1560_v3, %v626_v15 }
 0x7f4   : > { %v635_v18 = vrot.slane %v1846_v16, 4 }
 0x7f6   : > { %636 = vrot.lane.b32.xlu0 %v635_v18, %s1672_s9 }
 0x868   : > { %v637_v20 = vpop.permute.xlu0 %636 }
 0x869   : > { %1393 = vmatmul.mubr.msk.f32.vlgmr.msra.gmra.mrb[4].mxu0 %vm305_vm3, %v637_v20 }
 0x86a   : > { %1475 = vmatpush3.bf16.msra.mxu0 %v1773_v8  ;;  %1414 = vmatprep.mubr.msk.f32.mxu0 %vm1669_vm2, %v1670_v11 }
 0x86b   : > { %1476 = vmatprep.subr.bf16.mxu0 %v1668_v4 }
 0x86e   : > { %1478 = vmatpush3.bf16.msra.mxu0 %v1785_v13 }
 0x86f   : > { %1485 = vmatprep.subr.bf16.mxu0 %v1668_v4 }
 0x93c   : > { %v706_v21 = vpop.f32.mrb[4].mxu0 }
 0x93d   : > { %v711_v22 = vrot.slane %v706_v21, 2  ;;  %v1394_v23 = vpop.f32.mrb[5].mxu0 }
 0x93f   : > { %v713_v24 = vadd.f32 %v711_v22, %v1810_v19 }
 0x941   : > { %1563 = vtanh.f32 %v713_v24  ;;  %v1285_v26 = vmul.f32 -1.442695, %v713_v24 }
 0x943   : > { %1565 = vpow2.f32 %v1285_v26 }
 0x94b   : > { %v1564_v25 = vpop.eup %1563 }
 0x94c   : > { %726 = vrot.lane.b32.xlu1 %v1564_v25, %s1671_s7 }
 0x94d   : > { %v1566_v27 = vpop.eup %1565 }
 0x94e   : > { %v717_v28 = vadd.f32 1.0, %v1566_v27 }
 0x950   : > { %1567 = vrcp.f32 %v717_v28 }
 0x95a   : > { %v1568_v29 = vpop.eup %1567 }
 0x95b   : > { %v724_v33 = vmul.f32 %v1568_v29, %v722_v32 }
 0x9be   : > { %v727_v30 = vpop.permute.xlu1 %726 }
 0x9bf   : > { %v729_v31 = vmul.f32 %v1568_v29, %v727_v30 }
 0x9c1   : > { %731 = vrot.lane.b32.xlu0 %v729_v31, %s1672_s9 }
 0xa33   : > { %v732_v34 = vpop.permute.xlu0 %731 }
 0xa34   : > { %v734_v35 = vadd.f32 %v732_v34, %v724_v33 }
 0xa36   : > { %1569 = vtanh.f32 %v734_v35  ;;  %v831_v50 = vrot.slane %v734_v35, 6 }
 0xa40   : > { %v1570_v19 = vpop.eup %1569 }
 0xa41   : > { %737 = vrot.lane.b32.xlu1 %v1570_v19, %s1671_s7 }
 0xab3   : > { %v738_v36 = vpop.permute.xlu1 %737 }
 0xab4   : > { %v1861_v37 = vmul.f32 %v1568_v29, %v738_v36 }
 0xab6   : > { %v747_v38 = vrot.slane %v1861_v37, 6 }
 0xab8   : > { %748 = vrot.lane.b32.xlu0 %v747_v38, %s1672_s9 }
 0xb2a   : > { %v749_v39 = vpop.permute.xlu0 %748 }
 0xb2b   : > { %1404 = vmatmul.mubr.msk.f32.vlgmr.msra.gmra.mrb[4].mxu1 %vm305_vm3, %v749_v39 }
 0xb2c   : > { %1481 = vmatpush3.bf16.msra.mxu1 %v1773_v8  ;;  %1425 = vmatprep.mubr.msk.f32.mxu1 %vm1669_vm2, %v1670_v11 }
 0xb2d   : > { %1482 = vmatprep.subr.bf16.mxu1 %v1668_v4 }
 0xb30   : > { %1484 = vmatpush3.bf16.msra.mxu1 %v1785_v13 }
 0xbfe   : > { %v818_v40 = vpop.f32.mrb[4].mxu1 }
 0xbff   : > { %v822_v41 = vadd.f32 %v818_v40, %v1808_v17  ;;  %v1405_v42 = vpop.f32.mrb[5].mxu1 }
 0xc01   : > { %1571 = vtanh.f32 %v822_v41  ;;  %v1287_v44 = vmul.f32 -1.442695, %v822_v41 }
 0xc03   : > { %1573 = vpow2.f32 %v1287_v44 }
 0xc0b   : > { %v1572_v43 = vpop.eup %1571 }
 0xc0c   : > { %835 = vrot.lane.b32.xlu1 %v1572_v43, %s1671_s7 }
 0xc0d   : > { %v1574_v45 = vpop.eup %1573 }
 0xc0e   : > { %v826_v46 = vadd.f32 1.0, %v1574_v45 }
 0xc10   : > { %1575 = vrcp.f32 %v826_v46 }
 0xc1a   : > { %v1576_v47 = vpop.eup %1575 }
 0xc1b   : > { %v833_v51 = vmul.f32 %v1576_v47, %v831_v50 }
 0xc7e   : > { %v836_v48 = vpop.permute.xlu1 %835 }
 0xc7f   : > { %v838_v49 = vmul.f32 %v1576_v47, %v836_v48 }
 0xc81   : > { %840 = vrot.lane.b32.xlu0 %v838_v49, %s1672_s9 }
 0xcf3   : > { %v841_v52 = vpop.permute.xlu0 %840 }
 0xcf4   : > { %v843_v53 = vadd.f32 %v841_v52, %v833_v51 }
 0xcf6   : > { %1577 = vtanh.f32 %v843_v53 }
 0xd00   : > { %v1578_v54 = vpop.eup %1577 }
 0xd01   : > { %846 = vrot.lane.b32.xlu1 %v1578_v54, %s1671_s7 }
 0xd73   : > { %v847_v55 = vpop.permute.xlu1 %846 }
 0xd74   : > { %v849_v57 = vmul.f32 %v1576_v47, %v847_v55 }
 0xd76   : > { %851 = vrot.lane.b32.xlu0 %v849_v57, %s1672_s9 }
 0xde8   : > { %v852_v58 = vpop.permute.xlu0 %851 }
 0xde9   : > { %854 = vst.msk [vmem:[%s1757_s8 + $0x8] sm:$0x3] %vm412_vm4, %v852_v58  ;;  %1415 = vmatmul.mubr.msk.f32.vlgmr.msra.gmra.mrb[6].mxu0 %vm305_vm3, %v852_v58 }
 0xdea   : > { %1487 = vmatpush3.bf16.msra.mxu0 %v1773_v8  ;;  %1436 = vmatprep.mubr.msk.f32.mxu0 %vm1669_vm2, %v1670_v11 }
 0xdeb   : > { %1488 = vmatprep.subr.bf16.mxu0 %v1668_v4  ;;  %v939_v4 = vrot.slane %v843_v53, 6 }
 0xdee   : > { %1490 = vmatpush3.bf16.msra.mxu0 %v1785_v13 }
 0xebc   : > { %v923_v59 = vpop.f32.mrb[6].mxu0 }
 0xebd   : > { %v928_v60 = vrot.slane %v923_v59, 6  ;;  %v1416_v61 = vpop.f32.mrb[7].mxu0 }
 0xebf   : > { %v930_v62 = vadd.f32 %v928_v60, %v1808_v17 }
 0xec1   : > { %1579 = vtanh.f32 %v930_v62  ;;  %v1289_v0 = vmul.f32 -1.442695, %v930_v62 }
 0xec3   : > { %1581 = vpow2.f32 %v1289_v0 }
 0xecb   : > { %v1580_v63 = vpop.eup %1579 }
 0xecc   : > { %943 = vrot.lane.b32.xlu1 %v1580_v63, %s1671_s7 }
 0xecd   : > { %v1582_v1 = vpop.eup %1581 }
 0xece   : > { %v934_v8 = vadd.f32 1.0, %v1582_v1 }
 0xed0   : > { %1583 = vrcp.f32 %v934_v8 }
 0xeda   : > { %v1584_v2 = vpop.eup %1583 }
 0xedb   : > { %v941_v13 = vmul.f32 %v1584_v2, %v939_v4 }
 0xf3e   : > { %v944_v11 = vpop.permute.xlu1 %943 }
 0xf3f   : > { %v946_v3 = vmul.f32 %v1584_v2, %v944_v11 }
 0xf41   : > { %948 = vrot.lane.b32.xlu0 %v946_v3, %s1672_s9 }
 0xfb3   : > { %v949_v5 = vpop.permute.xlu0 %948 }
 0xfb4   : > { %v951_v6 = vadd.f32 %v949_v5, %v941_v13 }
 0xfb6   : > { %1585 = vtanh.f32 %v951_v6  ;;  %v1050_v29 = vrot.slane %v951_v6, 6 }
 0xfc0   : > { %v1586_v7 = vpop.eup %1585 }
 0xfc1   : > { %954 = vrot.lane.b32.xlu1 %v1586_v7, %s1671_s7 }
0x1033   : > { %v955_v9 = vpop.permute.xlu1 %954 }
0x1034   : > { %v1888_v10 = vmul.f32 %v1584_v2, %v955_v9 }
0x1036   : > { %v963_v12 = vrot.slane %v1888_v10, 2 }
0x1038   : > { %964 = vrot.lane.b32.xlu0 %v963_v12, %s1672_s9 }
0x10aa   : > { %v965_v14 = vpop.permute.xlu0 %964 }
0x10ab   : > { %1426 = vmatmul.mubr.msk.f32.vlgmr.msra.gmra.mrb[6].mxu1 %vm305_vm3, %v965_v14 }
0x117e   : > { %v1034_v15 = vpop.f32.mrb[6].mxu1 }
0x117f   : > { %v1039_v18 = vrot.slane %v1034_v15, 4  ;;  %v1427_v20 = vpop.f32.mrb[7].mxu1 }
0x1181   : > { %v1041_v21 = vadd.f32 %v1039_v18, %v1808_v17 }
0x1183   : > { %1587 = vtanh.f32 %v1041_v21  ;;  %v1291_v23 = vmul.f32 -1.442695, %v1041_v21 }
0x1185   : > { %1589 = vpow2.f32 %v1291_v23 }
0x118d   : > { %v1588_v22 = vpop.eup %1587 }
0x118e   : > { %1054 = vrot.lane.b32.xlu1 %v1588_v22, %s1671_s7 }
0x118f   : > { %v1590_v24 = vpop.eup %1589 }
0x1190   : > { %v1045_v25 = vadd.f32 1.0, %v1590_v24 }
0x1192   : > { %1591 = vrcp.f32 %v1045_v25 }
0x119c   : > { %v1592_v26 = vpop.eup %1591 }
0x119d   : > { %v1052_v30 = vmul.f32 %v1592_v26, %v1050_v29 }
0x1200   : > { %v1055_v27 = vpop.permute.xlu1 %1054 }
0x1201   : > { %v1057_v28 = vmul.f32 %v1592_v26, %v1055_v27 }
0x1203   : > { %1059 = vrot.lane.b32.xlu0 %v1057_v28, %s1672_s9 }
0x1275   : > { %v1060_v31 = vpop.permute.xlu0 %1059 }
0x1276   : > { %v1062_v32 = vadd.f32 %v1060_v31, %v1052_v30 }
0x1278   : > { %1593 = vtanh.f32 %v1062_v32 }
0x1282   : > { %v1594_v33 = vpop.eup %1593 }
0x1283   : > { %1065 = vrot.lane.b32.xlu1 %v1594_v33, %s1671_s7 }
0x12f5   : > { %v1066_v34 = vpop.permute.xlu1 %1065 }
0x12f6   : > { %v1068_v35 = vmul.f32 %v1592_v26, %v1066_v34 }
0x12f8   : > { %v1074_v19 = vrot.slane %v1068_v35, 4 }
0x12fa   : > { %1075 = vrot.lane.b32.xlu0 %v1074_v19, %s1672_s9 }
0x136c   : > { %v1076_v36 = vpop.permute.xlu0 %1075 }
0x136d   : > { %1437 = vmatmul.mubr.msk.f32.vlgmr.msra.gmra.mrb[8].mxu0 %vm305_vm3, %v1076_v36 }
0x1440   : > { %v1145_v38 = vpop.f32.mrb[8].mxu0 }
0x1441   : > { %v1150_v39 = vrot.slane %v1145_v38, 2  ;;  %v1438_v40 = vpop.f32.mrb[9].mxu0 }
0x1443   : > { %v1152_v41 = vadd.f32 %v1150_v39, %v1808_v17  ;;  %v1161_v17 = vrot.slane %v1062_v32, 6 }
0x1445   : > { %1595 = vtanh.f32 %v1152_v41  ;;  %v1293_v43 = vmul.f32 -1.442695, %v1152_v41 }
0x1447   : > { %1597 = vpow2.f32 %v1293_v43 }
0x144f   : > { %v1596_v42 = vpop.eup %1595 }
0x1450   : > { %1165 = vrot.lane.b32.xlu1 %v1596_v42, %s1671_s7 }
0x1451   : > { %v1598_v44 = vpop.eup %1597 }
0x1452   : > { %v1156_v45 = vadd.f32 1.0, %v1598_v44 }
0x1454   : > { %1599 = vrcp.f32 %v1156_v45 }
0x145e   : > { %v1600_v46 = vpop.eup %1599 }
0x145f   : > { %v1163_v49 = vmul.f32 %v1600_v46, %v1161_v17 }
0x14c2   : > { %v1166_v47 = vpop.permute.xlu1 %1165 }
0x14c3   : > { %v1168_v48 = vmul.f32 %v1600_v46, %v1166_v47 }
0x14c5   : > { %1170 = vrot.lane.b32.xlu0 %v1168_v48, %s1672_s9 }
0x14c9   : > { %518 = vrot.lane.b32.xlu0 %v1831_v56, %s1672_s9 }
0x14cd   : > { %742 = vrot.lane.b32.xlu0 %v1861_v37, %s1672_s9 }
0x14d1   : > { %1070 = vrot.lane.b32.xlu0 %v1068_v35, %s1672_s9 }
0x1537   : > { %v1171_v50 = vpop.permute.xlu0 %1170 }
0x1538   : > { %v1173_v51 = vadd.f32 %v1171_v50, %v1163_v49 }
0x153a   : > { %1601 = vtanh.f32 %v1173_v51  ;;  %1187 = vrot.lane.b32.xlu0 %v1173_v51, %s1673_s10 }
0x153b   : > { %v519_v52 = vpop.permute.xlu0 %518 }
0x153c   : > { %522 = vst.msk [vmem:[%s1757_s8] sm:$0xc] %vm521_vm5, %v519_v52 }
0x153f   : > { %v743_v56 = vpop.permute.xlu0 %742 }
0x1540   : > { %746 = vst.msk [vmem:[%s1757_s8] sm:$0xc0] %vm745_vm6, %v743_v56 }
0x1543   : > { %v1071_v37 = vpop.permute.xlu0 %1070 }
0x1544   : > { %v1602_v53 = vpop.eup %1601  ;;  %1073 = vst.msk [vmem:[%s1757_s8 + $0x8] sm:$0x30] %vm633_vm7, %v1071_v37 }
0x1545   : > { %1176 = vrot.lane.b32.xlu1 %v1602_v53, %s1671_s7 }
0x1549   : > { %630 = vrot.lane.b32.xlu1 %v1846_v16, %s1672_s9 }
0x154d   : > { %959 = vrot.lane.b32.xlu1 %v1888_v10, %s1672_s9 }
0x15ac   : > { %v1188_v54 = vpop.permute.xlu0 %1187 }
0x15ad   : > { %1190 = vst.msk [vmem:[#allocation3 - $0x6] sm:$0xc0] %vm745_vm6, %v1188_v54 }
0x15b7   : > { %v1177_v55 = vpop.permute.xlu1 %1176 }
0x15b8   : > { %v1179_v57 = vmul.f32 %v1600_v46, %v1177_v55 }
0x15ba   : > { %1181 = vrot.lane.b32.xlu1 %v1179_v57, %s1672_s9 }
0x15bb   : > { %v631_v58 = vpop.permute.xlu1 %630 }
0x15bc   : > { %634 = vst.msk [vmem:[%s1757_s8] sm:$0x30] %vm633_vm7, %v631_v58 }
0x15bf   : > { %v960_v59 = vpop.permute.xlu1 %959 }
0x15c0   : > { %962 = vst.msk [vmem:[%s1757_s8 + $0x8] sm:$0xc] %vm521_vm5, %v960_v59 }
0x162c   : > { %v1182_v16 = vpop.permute.xlu1 %1181 }
0x162d   : > { %1184 = vst.msk [vmem:[%s1757_s8 + $0x8] sm:$0xc0] %vm745_vm6, %v1182_v16  ;;  %1185 = vst.msk [vmem:[#allocation2 - $0x6] sm:$0xc0] %vm745_vm6, %v1182_v16 }
0x162e   : > { %1616 = shalt.err (!%p1613_p4)
}
0x162f   : > { %s1617_s27 = scalar_lea.hbm %s1927_s20, 256  ;;  %s1621_s5 = scalar_lea.hbm %s1981_s4, 512 }
0x1630   : > { %p1618_p7 = scmp.ne.s32.totalorder %s1927_s20, %s1617_s27  ;;  %p1622_p10 = scmp.lt.u32.totalorder %s1927_s20, %s1981_s4 }
0x1631   : > { %p1623_p11 = scmp.lt.u32.totalorder %s1621_s5, %s1617_s27  ;;  %p1625_p13 = scmp.lt.u32.totalorder %s1617_s27, %s1927_s20 }
0x1632   : > { %p1619_p8 = pnand %p1618_p7, %p1740_p5 }
0x1633   : > { %p1624_p12 = por %p1623_p11, %p1622_p10 }
0x1634   : > { %p1620_p9 = pneg %p1619_p8 }
0x1635   : > { %p1626_p0 = por %p1625_p13, %p1624_p12 }
0x1637   : > { %p1627_p1 = pnand %p1626_p0, %p1620_p9 }
0x1639   : > { %1630 = shalt.err (!%p1627_p1)
}
0x163a   : > { %s1675_s9 = smov 128   ;;  %s1676_s10 = smov 8  }
0x163b   : > { %1491 = dma.vmem_to_hbm [thread:$0]  (%p1740_p5), %s1929_s12, 256, %s1927_s20, %s1936_s22, %s1675_s9, %s1675_s9, %s1676_s10  }
0x163c PF: > { %p1497_p2 = scmp.ge.s32.totalorder %s1665_s18, 2  ;;  %s1220_s11 = sand.u32 1, %s1653_s15  }
0x163d   : > { %s1221_s13 = scalar_lea.sflag [#allocation5], %s1220_s11 }
0x163e   : > { %p1494_p3 = pnand %p1497_p2, %p1744_p6 }
0x1640   : > { %1648 = dma.done.wait (!%p1494_p3), %s1221_s13, 256  }
0x1641   : > { %1650 = vsyncadd (!%p1494_p3), %s1221_s13, 4294967040  ;;  %p14_p4 = scmp.ge.s32.totalorder %s1727_s21, 4   ;;  %s1984_s15 = smov %s1657_s16 }
0x1642   : > { %s1985_s16 = smov %s1661_s17  ;;  %s1986_s17 = smov %s1738_s24 }
0x1643   : > { %s1987_s18 = smov %s1727_s21  ;;  %16 = sbr.rel (!%p14_p4) target bundleno = 3 (0x3), region = 75 }
0x164a   :  { %1226 = vsyncpa [#allocation5], 1 }
0x164b   :  { %1228 = vsyncpa [#allocation5 + $0x1], 1 }

</bundles_post_ra>
